<compile_context>
chip_gen: v7x
topology: tpu7x:2x2x1
jax: 0.10.0
libtpu: 0.0.40
codegen_flags: <defaults>
</compile_context>

<pallas_src>
import jax
import jax.numpy as jnp
from jax.experimental import pallas as pl
from jax.experimental.pallas import tpu as pltpu

K_IN = 784      # 28 * 28
N_OUT = 10
N_PAD = 128     # lane-dense output width (minimum; do NOT widen, kernel is mem-bound)
TB_MAX = 2048   # batch tile cap; double-buffered f32 tiles stay << 32 MiB VMEM


def _round_up(n, m):
    return (n + m - 1) // m * m


def _choose_batch_tile(batch):
    # Prefer >= 2 grid steps so the "parallel" batch axis can shard across the
    # two v7x TensorCores; cap the tile so double-buffered f32 x tiles fit VMEM.
    tb = min(TB_MAX, _round_up(pl.cdiv(batch, 2), 16))
    if tb >= batch:
        # Tiny batch: a single block covering the whole batch (block_shape equal
        # to the array dim is always legal, no batch padding copy needed).
        tb = batch
    return tb


def linear_kernel(x_ref, w_ref, b_ref, o_ref):
    # x_ref: (tb, 784) f32, w_ref: (784, 128) bf16, b_ref: (1, 128) f32,
    # o_ref: (tb, 128) f32.
    # Cast x to bf16 (VPU), contract on the MXU with f32 accumulation, then add
    # the exact f32 bias as a VPU epilogue; the store is fully lane-dense.
    x_bf16 = x_ref[...].astype(jnp.bfloat16)
    acc = jnp.dot(x_bf16, w_ref[...], preferred_element_type=jnp.float32)
    o_ref[...] = acc + b_ref[...]


def prepare_params(w, b):
    """One-time packing of PyTorch Linear(784, 10) params for the kernel.

    w: (10, 784) f32 (PyTorch nn.Linear weight layout), b: (10,) f32.
    Returns (w_packed: (784, 128) bf16, b_packed: (1, 128) f32).
    """
    w_pad = jnp.zeros((K_IN, N_PAD), jnp.float32)
    w_pad = w_pad.at[:, :N_OUT].set(w.T)
    w_packed = w_pad.astype(jnp.bfloat16)
    b_packed = jnp.zeros((1, N_PAD), jnp.float32).at[0, :N_OUT].set(b)
    return w_packed, b_packed


@jax.jit
def neural_network_forward(x_nchw, w_packed, b_packed):
    """Forward of nn.Sequential(nn.Flatten(), nn.Linear(784, 10)).

    x_nchw:   (B, 1, 28, 28) float32
    w_packed: (784, 128) bfloat16 from prepare_params
    b_packed: (1, 128)   float32  from prepare_params
    returns   (B, 10) float32
    """
    batch = x_nchw.shape[0]
    x_flat = x_nchw.reshape(batch, K_IN)   # nn.Flatten(): contiguous, no HBM copy

    tb = _choose_batch_tile(batch)
    grid = (pl.cdiv(batch, tb),)           # partial last block is masked by Pallas

    out = pl.pallas_call(
        linear_kernel,
        out_shape=jax.ShapeDtypeStruct((batch, N_PAD), jnp.float32),
        grid=grid,
        in_specs=[
            pl.BlockSpec((tb, K_IN), lambda i: (i, 0)),     # x tile (f32, raw)
            pl.BlockSpec((K_IN, N_PAD), lambda i: (0, 0)),  # packed weight (bf16)
            pl.BlockSpec((1, N_PAD), lambda i: (0, 0)),     # f32 bias row
        ],
        out_specs=pl.BlockSpec((tb, N_PAD), lambda i: (i, 0)),
        compiler_params=pltpu.CompilerParams(
            dimension_semantics=("parallel",),
            vmem_limit_bytes=32 * 1024 * 1024,
        ),
    )(x_flat, w_packed, b_packed)

    return out[:, :N_OUT]


if __name__ == "__main__":
    key = jax.random.PRNGKey(0)
    k_x, k_w, k_b = jax.random.split(key, 3)

    B = 2
    # Deterministic synthetic parameters (PyTorch Linear(784, 10) layout).
    bound = 1.0 / (K_IN ** 0.5)  # matches nn.Linear's kaiming-uniform bound
    w = jax.random.uniform(k_w, (N_OUT, K_IN), jnp.float32, -bound, bound)
    b = jax.random.uniform(k_b, (N_OUT,), jnp.float32, -bound, bound)

    # Deterministic example input: (B, 1, 28, 28) NCHW.
    x = jax.random.normal(k_x, (B, 1, 28, 28), jnp.float32)

    # Weight packing is hoisted out of the per-forward path (done once here).
    w_packed, b_packed = prepare_params(w, b)

    y = neural_network_forward(x, w_packed, b_packed)
    jax.block_until_ready(y)

    # Pure-JAX f32 reference (kernel casts x/w to bf16 with f32 accumulation
    # and an exact f32 bias, so compare with a bf16-appropriate tolerance).
    y_ref = x.reshape(B, -1) @ w.T + b
    assert y.shape == (B, N_OUT)
    assert jnp.allclose(y, y_ref, atol=2e-2, rtol=2e-2), (
        f"max abs err {jnp.max(jnp.abs(y - y_ref))}"
    )

    print("KERNEL_OK")
</pallas_src>

<mosaic_0001>
module attributes {stable_mosaic.version = 11 : i64} {
  func.func @linear_kernel(%arg0: i32, %arg1: memref<2x784xf32, #tpu.memory_space<vmem>>, %arg2: memref<784x128xbf16, #tpu.memory_space<vmem>>, %arg3: memref<1x128xf32, #tpu.memory_space<vmem>>, %arg4: memref<2x128xf32, #tpu.memory_space<vmem>>) attributes {dimension_semantics = [#tpu.dimension_semantics<parallel>], iteration_bounds = array<i64: 1>, scalar_prefetch = 0 : i64, scratch_operands = 0 : i64, tpu.core_type = #tpu.core_type<tc>, window_params = [{transform_indices = @transform_0, window_bounds = array<i64: 2, 784>}, {pipeline_mode = #tpu.pipeline_mode<synchronous>, transform_indices = @transform_1, window_bounds = array<i64: 784, 128>}, {pipeline_mode = #tpu.pipeline_mode<synchronous>, transform_indices = @transform_2, window_bounds = array<i64: 1, 128>}, {transform_indices = @transform_3, window_bounds = array<i64: 2, 128>}]} {
    %c0 = arith.constant 0 : index
    %c0_0 = arith.constant 0 : index
    %0 = vector.load %arg1[%c0, %c0_0] : memref<2x784xf32, #tpu.memory_space<vmem>>, vector<2x784xf32>
    %1 = arith.truncf %0 : vector<2x784xf32> to vector<2x784xbf16>
    %c0_1 = arith.constant 0 : index
    %c0_2 = arith.constant 0 : index
    %2 = vector.load %arg2[%c0_1, %c0_2] : memref<784x128xbf16, #tpu.memory_space<vmem>>, vector<784x128xbf16>
    %cst = arith.constant dense<0.000000e+00> : vector<2x128xf32>
    %3 = tpu.matmul %1, %2, %cst {dimension_numbers = #tpu.dot_dimension_numbers<[1], [0], [0], [1], [0, 0, 1, 1], [], []>} : vector<2x784xbf16>, vector<784x128xbf16>, vector<2x128xf32> -> vector<2x128xf32>
    %c0_3 = arith.constant 0 : index
    %c0_4 = arith.constant 0 : index
    %4 = vector.load %arg3[%c0_3, %c0_4] : memref<1x128xf32, #tpu.memory_space<vmem>>, vector<1x128xf32>
    %5 = vector.broadcast %4 : vector<1x128xf32> to vector<2x128xf32>
    %6 = arith.addf %3, %5 : vector<2x128xf32>
    %c0_5 = arith.constant 0 : index
    %c0_6 = arith.constant 0 : index
    %7 = vector.load %arg4[%c0_5, %c0_6] : memref<2x128xf32, #tpu.memory_space<vmem>>, vector<2x128xf32>
    tpu.vector_store %arg4[%c0_5, %c0_6], %6 {strides = array<i32>} : memref<2x128xf32, #tpu.memory_space<vmem>>, vector<2x128xf32>,
    return
  }
  func.func @transform_0(%arg0: i32) -> (i32, i32) {
    %c0_i32 = arith.constant 0 : i32
    %c0_i32_0 = arith.constant 0 : i32
    return %arg0, %c0_i32 : i32, i32
  }
  func.func @transform_1(%arg0: i32) -> (i32, i32) {
    %c0_i32 = arith.constant 0 : i32
    %c0_i32_0 = arith.constant 0 : i32
    %c0_i32_1 = arith.constant 0 : i32
    return %c0_i32, %c0_i32_0 : i32, i32
  }
  func.func @transform_2(%arg0: i32) -> (i32, i32) {
    %c0_i32 = arith.constant 0 : i32
    %c0_i32_0 = arith.constant 0 : i32
    %c0_i32_1 = arith.constant 0 : i32
    return %c0_i32, %c0_i32_0 : i32, i32
  }
  func.func @transform_3(%arg0: i32) -> (i32, i32) {
    %c0_i32 = arith.constant 0 : i32
    %c0_i32_0 = arith.constant 0 : i32
    return %arg0, %c0_i32 : i32, i32
  }
}

</mosaic_0001>

<bundles_post_ra>
// kernel: neural_network_forward.1
= control target key start
LH: loop header
LB: loop body
LE: loop exit
PB: predicated region body
PF: predicated region fallthrough
CT: control target
= control target key end

     0   :  { %8 = vsyncpa [#allocation3], 0  ;;  %s951_s0 = inlined_call_operand.vmem [shape: f32[2,784], index: 0, kind: input, shape index: {}]   ;;  %s952_s1 = inlined_call_operand.hbm [shape: bf16[784,128], index: 1, kind: input, shape index: {}]   ;;  %s953_s2 = inlined_call_operand.vmem [shape: f32[1,128], index: 2, kind: input, shape index: {}]   ;;  %s954_s3 = inlined_call_operand.hbm [shape: f32[2,128], index: 3, kind: output, shape index: {}]  }
   0x1   :  { %9 = vsyncpa [#allocation4], 0  ;;  %s891_s12 = smov [#allocation2]   ;;  %s843_s16 = scalar_lea.hbm %s952_s1, 6272 }
   0x2   :  { %s17_s13 = sshll.u32 %s891_s12, 4  ;;  %p844_p0 = scmp.ne.s32.totalorder %s952_s1, %s843_s16  ;;  %s18_s13 = int_to_ptr.vmem [resolvable:$true] %s17_s13 }
   0x3   :  { %p847_p1 = scmp.lt.u32.totalorder %s843_s16, %s952_s1 }
   0x5   :  { %p849_p2 = pnand %p847_p1, %p844_p0 }
   0x7   :  { %852 = shalt.err (!%p849_p2)
}
   0x8   :  { %s853_s21 = scalar_lea.vmem %s18_s13, 6272  ;;  %p858_p4 = scmp.lt.s32.totalorder %s18_s13, %s18_s13 }
   0x9   :  { %p854_p3 = scmp.ne.s32.totalorder %s18_s13, %s853_s21  ;;  %p859_p5 = scmp.lt.s32.totalorder %s853_s21, %s853_s21 }
   0xb   :  { %p860_p6 = por %p859_p5, %p858_p4 }
   0xd   :  { %p861_p7 = pnand %p860_p6, %p854_p3 }
   0xf   :  { %864 = shalt.err (!%p861_p7)
}
  0x10   :  { %s892_s22 = smov 64   ;;  %s893_s23 = smov 4  }
  0x11   :  { %23 = dma.hbm_to_vmem [thread:$0]  %s952_s1, 6272, %s18_s13, [#allocation3], %s892_s22, %s892_s22, %s893_s23  }
  0x12   :  { %887 = dma.done.wait [#allocation3], 6272  }
  0x13   :  { %888 = vsyncadd [#allocation3], 4294961024  ;;  %v792_v0 = vld [vmem:[#allocation2 + $0x40] sm:$0xff]   ;;  %v796_v4 = vld [vmem:[#allocation2 + $0x48] sm:$0xff]   ;;  %v894_v21 = vmov 1983009808   ;;  %v38_v23 = vlaneseq }
  0x14   :  { %v793_v1 = vld [vmem:[#allocation2] sm:$0xff]   ;;  %711 = vmatprep.subr.bf16.mxu0 %v792_v0  ;;  %v797_v5 = vld [vmem:[#allocation2 + $0x8] sm:$0xff]   ;;  %v800_v8 = vld [vmem:[#allocation2 + $0x50] sm:$0xff]   ;;  %v36_v22 = vunpack.c.l.s4 %v894_v21  ;;  %v895_v45 = vmov 0.0   ;;  %vm896_vm0 = vmmov 0   ;;  %vm480_vm1 = vcmask 130048  }
  0x15   :  { %v794_v2 = vld [vmem:[#allocation2 + $0xc0] sm:$0xff]   ;;  %712 = vmatpush3.bf16.msra.mxu0 %v793_v1  ;;  %v798_v6 = vld [vmem:[#allocation2 + $0xc8] sm:$0xff]   ;;  %v801_v9 = vld [vmem:[#allocation2 + $0x10] sm:$0xff]   ;;  %v39_v29 = vshrl.u32 %v38_v23, 7 }
  0x16   :  { %v795_v3 = vld [vmem:[#allocation2 + $0x80] sm:$0xff]   ;;  %733 = vmatprep.subr.bf16.mxu1 %v794_v2  ;;  %713 = vmatprep.subr.bf16.mxu0 %v796_v4  ;;  %v799_v7 = vld [vmem:[#allocation2 + $0x88] sm:$0xff]   ;;  %v802_v10 = vld [vmem:[#allocation2 + $0xd0] sm:$0xff]   ;;  %v37_v28 = vunpack.c.0.s8 %v36_v22 }
  0x17   :  { %734 = vmatpush3.bf16.msra.mxu1 %v795_v3  ;;  %v803_v11 = vld [vmem:[#allocation2 + $0x90] sm:$0xff]   ;;  %v804_v12 = vld [vmem:[#allocation2 + $0x58] sm:$0xff]   ;;  %v808_v16 = vld [vmem:[#allocation2 + $0x60] sm:$0xff]  }
  0x18   :  { %735 = vmatprep.subr.bf16.mxu1 %v798_v6  ;;  %v805_v13 = vld [vmem:[#allocation2 + $0x18] sm:$0xff]   ;;  %v809_v17 = vld [vmem:[#allocation2 + $0x20] sm:$0xff]   ;;  %v812_v20 = vld [vmem:[#allocation2 + $0x68] sm:$0xff]   ;;  %v40_v34 = vsub.s32 %v37_v28, %v39_v29 }
  0x19   :  { %714 = vmatpush3.bf16.msra.mxu0 %v797_v5  ;;  %v806_v14 = vld [vmem:[#allocation2 + $0xd8] sm:$0xff]   ;;  %v810_v18 = vld [vmem:[#allocation2 + $0xe0] sm:$0xff]   ;;  %v813_v24 = vld [vmem:[#allocation2 + $0x28] sm:$0xff]  }
  0x1a   :  { %715 = vmatprep.subr.bf16.mxu0 %v800_v8  ;;  %v807_v15 = vld [vmem:[#allocation2 + $0x98] sm:$0xff]   ;;  %v811_v19 = vld [vmem:[#allocation2 + $0xa0] sm:$0xff]   ;;  %v814_v25 = vld [vmem:[#allocation2 + $0xe8] sm:$0xff]  }
  0x1b   :  { %736 = vmatpush3.bf16.msra.mxu1 %v799_v7  ;;  %v815_v26 = vld [vmem:[#allocation2 + $0xa8] sm:$0xff]   ;;  %v816_v27 = vld [vmem:[#allocation2 + $0x70] sm:$0xff]   ;;  %v820_v33 = vld [vmem:[#allocation2 + $0x78] sm:$0xff]  }
  0x1c   :  { %737 = vmatprep.subr.bf16.mxu1 %v802_v10  ;;  %v817_v30 = vld [vmem:[#allocation2 + $0x30] sm:$0xff]   ;;  %v821_v35 = vld [vmem:[#allocation2 + $0x38] sm:$0xff]   ;;  %v30_v37 = vld [vmem:[%s951_s0] sm:$0xff] }
  0x1d   :  { %716 = vmatpush3.bf16.msra.mxu0 %v801_v9  ;;  %v818_v31 = vld [vmem:[#allocation2 + $0xf0] sm:$0xff]   ;;  %v822_v36 = vld [vmem:[#allocation2 + $0xf8] sm:$0xff]   ;;  %v41_v38 = vrot.slane %v30_v37, %v40_v34  ;;  %v34_v40 = vcombine.high %v30_v37, %v30_v37  ;;  %v824_v41 = vld [vmem:[#allocation2 + $0x140] sm:$0xff]  }
  0x1e   :  { %717 = vmatprep.subr.bf16.mxu0 %v804_v12  ;;  %v819_v32 = vld [vmem:[#allocation2 + $0xb0] sm:$0xff]   ;;  %v823_v39 = vld [vmem:[#allocation2 + $0xb8] sm:$0xff]   ;;  %v826_v48 = vld [vmem:[#allocation2 + $0x100] sm:$0xff]  }
  0x1f   :  { %738 = vmatpush3.bf16.msra.mxu1 %v803_v11  ;;  %v49_v42 = vcombine.high %v41_v38, %v41_v38  ;;  %v48_v43 = vrot.slane %v34_v40, %v40_v34  ;;  %v74_v44 = vpack.c.bf16 %v41_v38, %v41_v38  ;;  %v827_v50 = vld [vmem:[#allocation2 + $0x148] sm:$0xff]   ;;  %v829_v53 = vld [vmem:[#allocation2 + $0x150] sm:$0xff]   ;;  %v831_v55 = vld [vmem:[#allocation2 + $0x158] sm:$0xff]  }
  0x20   :  { %739 = vmatprep.subr.bf16.mxu1 %v806_v14  ;;  %v828_v52 = vld [vmem:[#allocation2 + $0x108] sm:$0xff]   ;;  %v830_v54 = vld [vmem:[#allocation2 + $0x110] sm:$0xff]   ;;  %v832_v56 = vld [vmem:[#allocation2 + $0x118] sm:$0xff]  }
  0x21   :  { %718 = vmatpush3.bf16.msra.mxu0 %v805_v13  ;;  %v75_v46 = vpack.c.bf16 %v49_v42, %v49_v42  ;;  %v50_v47 = vcombine.high %v48_v43, %v48_v43  ;;  %v76_v49 = vpack.c.bf16 %v48_v43, %v48_v43  ;;  %v833_v57 = vld [vmem:[#allocation2 + $0x160] sm:$0xff]   ;;  %v31_v59 = vld [vmem:[%s951_s0 + $0x8] sm:$0x3f]  ;;  %v837_v5 = vld [vmem:[#allocation2 + $0x170] sm:$0xff]  }
  0x22   :  { %719 = vmatprep.subr.bf16.mxu0 %v808_v16  ;;  %v841_v58 = vld [vmem:[#allocation2 + $0x180] sm:$0xff]   ;;  %v51_v60 = vcombine.high %v31_v59, %v31_v59  ;;  %v58_v61 = vrot.slane %v31_v59, %v40_v34  ;;  %v835_v1 = vld [vmem:[#allocation2 + $0x168] sm:$0xff]   ;;  %v838_v6 = vld [vmem:[#allocation2 + $0x130] sm:$0xff]  }
  0x23   :  { %740 = vmatpush3.bf16.msra.mxu1 %v807_v15  ;;  %516 = vmatprep.mubr.bf16.mxu0 %v75_v46  ;;  %v77_v51 = vpack.c.bf16 %v50_v47, %v50_v47  ;;  %v834_v62 = vld [vmem:[#allocation2 + $0x120] sm:$0xff]   ;;  %v836_v4 = vld [vmem:[#allocation2 + $0x128] sm:$0xff]   ;;  %v839_v7 = vld [vmem:[#allocation2 + $0x178] sm:$0xff]  }
  0x24   :  { %741 = vmatprep.subr.bf16.mxu1 %v810_v18  ;;  %v65_v63 = vrot.slane %v51_v60, %v40_v34  ;;  %v66_v0 = vcombine.high %v58_v61, %v58_v61  ;;  %v840_v8 = vld [vmem:[#allocation2 + $0x138] sm:$0xff]   ;;  %v78_v9 = vpack.c.bf16 %v58_v61, %v58_v61  ;;  %v660_v11 = vld [vmem:[%s953_s2] ss:$0 sm:$0xff]  ;;  %s897_s2 = smov [#allocation5]  }
  0x25   :  { %720 = vmatpush3.bf16.msra.mxu0 %v809_v17  ;;  %556 = vmatprep.mubr.bf16.mxu1 %v77_v51  ;;  %s651_s30 = sshll.u32 %s897_s2, 4  ;;  %s652_s30 = int_to_ptr.vmem [resolvable:$true] %s651_s30 }
  0x26   :  { %721 = vmatprep.subr.bf16.mxu0 %v812_v20  ;;  %v79_v2 = vpack.c.bf16 %v66_v0, %v66_v0  ;;  %v80_v3 = vpack.c.bf16 %v65_v63, %v65_v63  ;;  %s865_s4 = scalar_lea.vmem %s652_s30, 32  ;;  %p870_p9 = scmp.lt.s32.totalorder %s652_s30, %s652_s30 }
  0x27   :  { %742 = vmatpush3.bf16.msra.mxu1 %v811_v19  ;;  %p866_p8 = scmp.ne.s32.totalorder %s652_s30, %s865_s4  ;;  %p871_p10 = scmp.lt.s32.totalorder %s865_s4, %s865_s4 }
  0x28   :  { %743 = vmatprep.subr.bf16.mxu1 %v814_v25 }
  0x29   :  { %722 = vmatpush3.bf16.msra.mxu0 %v813_v24  ;;  %p872_p11 = por %p871_p10, %p870_p9 }
  0x2a   :  { %723 = vmatprep.subr.bf16.mxu0 %v816_v27 }
  0x2b   :  { %744 = vmatpush3.bf16.msra.mxu1 %v815_v26  ;;  %p873_p12 = pnand %p872_p11, %p866_p8 }
  0x2c   :  { %745 = vmatprep.subr.bf16.mxu1 %v818_v31 }
  0x2d   :  { %724 = vmatpush3.bf16.msra.mxu0 %v817_v30 }
  0x2e   :  { %725 = vmatprep.subr.bf16.mxu0 %v820_v33 }
  0x2f   :  { %746 = vmatpush3.bf16.msra.mxu1 %v819_v32 }
  0x30   :  { %747 = vmatprep.subr.bf16.mxu1 %v822_v36 }
  0x31   :  { %726 = vmatpush3.bf16.msra.mxu0 %v821_v35 }
  0x32   :  { %755 = vmatprep.subr.bf16.mxu0 %v824_v41 }
  0x33   :  { %748 = vmatpush3.bf16.msra.mxu1 %v823_v39 }
  0x34   :  { %779 = vmatprep.subr.bf16.mxu1 %v895_v45  ;;  %517 = vmatmul.mubr.bf16.vlgmr.msra.gmra.mrb[0].mxu0 %v74_v44 }
  0x35   :  { %756 = vmatpush3.bf16.msra.mxu0 %v826_v48  ;;  %596 = vmatprep.mubr.bf16.mxu0 %v79_v2 }
  0x36   :  { %557 = vmatmul.mubr.bf16.vlgmr.msra.gmra.mrb[0].mxu1 %v76_v49  ;;  %757 = vmatprep.subr.bf16.mxu0 %v827_v50 }
  0x37   :  { %781 = vmatprep.mubr.msk.bf16.mxu1 %vm896_vm0, %v895_v45  ;;  %780 = vmatpush3.bf16.msra.mxu1 %v841_v58 }
  0x39   :  { %758 = vmatpush3.bf16.msra.mxu0 %v828_v52 }
  0x3a   :  { %759 = vmatprep.subr.bf16.mxu0 %v829_v53 }
  0x3d   :  { %760 = vmatpush3.bf16.msra.mxu0 %v830_v54 }
  0x3e   :  { %761 = vmatprep.subr.bf16.mxu0 %v831_v55  ;;  %782 = vmatmul.mubr.msk.bf16.vlgmr.msra.gmra.mrb[4].mxu1 %vm480_vm1, %v80_v3 }
  0x41   :  { %762 = vmatpush3.bf16.msra.mxu0 %v832_v56 }
  0x42   :  { %763 = vmatprep.subr.bf16.mxu0 %v833_v57 }
  0x45   :  { %764 = vmatpush3.bf16.msra.mxu0 %v834_v62 }
  0x46   :  { %765 = vmatprep.subr.bf16.mxu0 %v835_v1 }
  0x49   :  { %766 = vmatpush3.bf16.msra.mxu0 %v836_v4 }
  0x4a   :  { %767 = vmatprep.subr.bf16.mxu0 %v837_v5 }
  0x4d   :  { %768 = vmatpush3.bf16.msra.mxu0 %v838_v6 }
  0x4e   :  { %769 = vmatprep.subr.bf16.mxu0 %v839_v7 }
  0x51   :  { %770 = vmatpush3.bf16.msra.mxu0 %v840_v8 }
  0x54   :  { %597 = vmatmul.mubr.bf16.vlgmr.msra.gmra.mrb[4].mxu0 %v78_v9 }
 0x107   :  { %v727_v10 = vpop.f32.mrb[0].mxu0 }
 0x108   :  { %v728_v12 = vpop.f32.mrb[1].mxu0 }
 0x109   :  { %v729_v13 = vadd.f32 %v728_v12, %v727_v10  ;;  %v730_v14 = vpop.f32.mrb[2].mxu0  ;;  %v749_v15 = vpop.f32.mrb[0].mxu1 }
 0x10a   :  { %v731_v16 = vpop.f32.mrb[3].mxu0  ;;  %v750_v17 = vpop.f32.mrb[1].mxu1 }
 0x10b   :  { %v519_v18 = vadd.f32 %v729_v13, %v660_v11  ;;  %v751_v19 = vadd.f32 %v750_v17, %v749_v15  ;;  %v752_v20 = vpop.f32.mrb[2].mxu1 }
 0x10c   :  { %v753_v21 = vpop.f32.mrb[3].mxu1 }
 0x10d   :  { %v559_v22 = vadd.f32 %v751_v19, %v519_v18 }
 0x111   :  { %v638_v23 = vpop.f32.mrb[4].mxu1 }
 0x112   :  { %v783_v24 = vpop.f32.mrb[5].mxu1 }
 0x113   :  { %v641_v25 = vpop.f32.mrb[6].mxu1 }
 0x114   :  { %v784_v26 = vpop.f32.mrb[7].mxu1 }
 0x127   :  { %v771_v27 = vpop.f32.mrb[4].mxu0 }
 0x128   :  { %v772_v28 = vpop.f32.mrb[5].mxu0 }
 0x129   :  { %v773_v29 = vadd.f32 %v772_v28, %v771_v27  ;;  %v774_v30 = vpop.f32.mrb[6].mxu0 }
 0x12a   :  { %v775_v31 = vpop.f32.mrb[7].mxu0 }
 0x12b   :  { %v599_v32 = vadd.f32 %v773_v29, %v559_v22 }
 0x12d   :  { %v639_v33 = vadd.f32 %v638_v23, %v599_v32 }
 0x12f   :  { %644 = vst [vmem:[#allocation5] sm:$0x3] %v639_v33 }
 0x130   :  { %876 = shalt.err (!%p873_p12)
}
 0x131   :  { %s877_s7 = scalar_lea.hbm %s954_s3, 32 }
 0x132   :  { %p878_p13 = scmp.ne.s32.totalorder %s954_s3, %s877_s7  ;;  %p881_p0 = scmp.lt.u32.totalorder %s877_s7, %s954_s3 }
 0x134   :  { %p883_p1 = pnand %p881_p0, %p878_p13 }
 0x136   :  { %886 = shalt.err (!%p883_p1)
}
 0x137   :  { %654 = dma.vmem_to_hbm [thread:$0]  %s652_s30, 32, %s954_s3, [#allocation4]  }
 0x138   :  { %889 = dma.done.wait [#allocation4], 32  }
 0x139   :  { %890 = vsyncadd [#allocation4], 4294967264 }
 0x13a   :  { %658 = vsyncpa [#allocation3], 1 }
 0x13b   :  { %659 = vsyncpa [#allocation4], 1 }

</bundles_post_ra>
